<compile_context>
chip_gen: v5e
topology: v5e:2x2
jax: 0.10.0
libtpu: 0.0.40
codegen_flags: <defaults>
</compile_context>

<pallas_src>
import jax
import jax.numpy as jnp
from jax.experimental import pallas as pl
from jax.experimental.pallas import tpu as pltpu

INPUT_DIM = 1
OUTPUT_DIM = 1
LANE = 128
SUBLANE = 8
CHUNK = LANE * SUBLANE  # 1024: repack granule -> rows is always a multiple of 8


def scale_bias_kernel(x_ref, w_ref, b_ref, o_ref):
    # x_ref: (tile_rows, 128) VMEM tile; w_ref/b_ref: (1, 1) SMEM scalars.
    o_ref[...] = x_ref[...] * w_ref[0, 0] + b_ref[0, 0]


def _run_scale_bias(x2, w_s, b_s, tile_rows):
    rows, lane = x2.shape
    grid = (pl.cdiv(rows, tile_rows),)
    itemsize = jnp.dtype(x2.dtype).itemsize
    return pl.pallas_call(
        scale_bias_kernel,
        out_shape=jax.ShapeDtypeStruct((rows, lane), x2.dtype),
        grid_spec=pltpu.PrefetchScalarGridSpec(
            num_scalar_prefetch=0,
            grid=grid,
            in_specs=[
                pl.BlockSpec((tile_rows, lane), lambda i: (i, 0)),
                pl.BlockSpec(memory_space=pltpu.MemorySpace.SMEM),
                pl.BlockSpec(memory_space=pltpu.MemorySpace.SMEM),
            ],
            out_specs=pl.BlockSpec((tile_rows, lane), lambda i: (i, 0)),
        ),
        compiler_params=pltpu.CompilerParams(
            dimension_semantics=("parallel",),
            vmem_limit_bytes=32 * 1024 * 1024,
        ),
        cost_estimate=pl.CostEstimate(
            flops=2 * rows * lane,
            transcendentals=0,
            bytes_accessed=2 * rows * lane * itemsize),
    )(x2, w_s, b_s)


def linear_regression_forward(x, w, b, tile_rows=4096):
    """x: (N, 1) f32, w: (1, 1) f32, b: (1,) f32 -> (N, 1) f32 == x @ w.T + b."""
    n, in_dim = x.shape
    out_dim = w.shape[0]
    assert in_dim == 1 and out_dim == 1, "kernel is specialized to nn.Linear(1, 1)"

    w_s = w.reshape(1, 1).astype(x.dtype)
    b_s = b.reshape(1, 1).astype(x.dtype)

    # Lane-dense repack: (N, 1) -> (rows, 128) with rows a multiple of 8.
    if n % CHUNK == 0:
        # Fast path: reshape is a free bitcast, no pad and no final slice.
        rows = n // LANE
        x2 = x.reshape(rows, LANE)
        pad = 0
    else:
        n_pad = ((n + CHUNK - 1) // CHUNK) * CHUNK
        rows = n_pad // LANE
        pad = n_pad - n
        x2 = jnp.pad(x.reshape(-1), (0, pad)).reshape(rows, LANE)

    # tile_rows: multiple of 8, <= rows, capped at 8192 (4 MiB f32/block).
    tile_rows = max(SUBLANE, min(int(tile_rows), 8192, rows))
    tile_rows = (tile_rows // SUBLANE) * SUBLANE
    # If a single tile would cover everything but there is enough work to split,
    # force grid >= 2 so the parallel axis can shard across v7x's two TCs.
    if rows >= 2 * SUBLANE and tile_rows >= rows:
        half = (rows + 1) // 2
        tile_rows = ((half + SUBLANE - 1) // SUBLANE) * SUBLANE

    out2 = _run_scale_bias(x2, w_s, b_s, tile_rows)

    if pad == 0:
        return out2.reshape(n, out_dim)
    # Strip padded tail (only taken when N is not a multiple of 1024).
    return out2.reshape(-1)[:n].reshape(n, out_dim)


if __name__ == "__main__":
    key = jax.random.PRNGKey(0)
    kx, kw, kb = jax.random.split(key, 3)

    # Deterministic parameter init (mimics nn.Linear uniform(-1/sqrt(fan_in), ...)).
    bound = 1.0 / (INPUT_DIM ** 0.5)
    w = jax.random.uniform(kw, (OUTPUT_DIM, INPUT_DIM), minval=-bound, maxval=bound,
                           dtype=jnp.float32)
    b = jax.random.uniform(kb, (OUTPUT_DIM,), minval=-bound, maxval=bound,
                           dtype=jnp.float32)

    # Small batch consistent with the module's (N, 1) -> (N, 1) forward.
    N = 8
    x = jax.random.normal(kx, (N, INPUT_DIM), dtype=jnp.float32)
    out = linear_regression_forward(x, w, b)
    jax.block_until_ready(out)
    ref = x @ w.T + b
    assert out.shape == (N, OUTPUT_DIM)
    assert jnp.allclose(out, ref, atol=1e-5), "mismatch vs reference (N=8)"

    # Fast path (no pad / no slice) with a multi-step grid.
    N2 = 4096
    x_mid = jax.random.normal(kx, (N2, INPUT_DIM), dtype=jnp.float32)
    out_mid = linear_regression_forward(x_mid, w, b, tile_rows=8)
    jax.block_until_ready(out_mid)
    ref_mid = x_mid @ w.T + b
    assert out_mid.shape == (N2, OUTPUT_DIM)
    assert jnp.allclose(out_mid, ref_mid, atol=1e-5), "mismatch vs reference (N=4096)"

    # Padded path with a partial last grid block.
    N3 = 3000
    x_big = jax.random.normal(kx, (N3, INPUT_DIM), dtype=jnp.float32)
    out_big = linear_regression_forward(x_big, w, b, tile_rows=16)
    jax.block_until_ready(out_big)
    ref_big = x_big @ w.T + b
    assert out_big.shape == (N3, OUTPUT_DIM)
    assert jnp.allclose(out_big, ref_big, atol=1e-5), "mismatch vs reference (N=3000)"

    print("KERNEL_OK")
</pallas_src>

<mosaic_0001>
module attributes {stable_mosaic.version = 11 : i64} {
  func.func @scale_bias_kernel(%arg0: i32, %arg1: memref<8x128xf32, #tpu.memory_space<vmem>>, %arg2: memref<1x1xf32, #tpu.memory_space<smem>>, %arg3: memref<1x1xf32, #tpu.memory_space<smem>>, %arg4: memref<8x128xf32, #tpu.memory_space<vmem>>) attributes {dimension_semantics = [#tpu.dimension_semantics<parallel>], iteration_bounds = array<i64: 1>, scalar_prefetch = 0 : i64, scratch_operands = 0 : i64, tpu.core_type = #tpu.core_type<tc>, window_params = [{transform_indices = @transform_0, window_bounds = array<i64: 8, 128>}, {transform_indices = @transform_1, window_bounds = array<i64: 1, 1>}, {transform_indices = @transform_2, window_bounds = array<i64: 1, 1>}, {transform_indices = @transform_3, window_bounds = array<i64: 8, 128>}]} {
    %c0 = arith.constant 0 : index
    %c0_0 = arith.constant 0 : index
    %0 = vector.load %arg1[%c0, %c0_0] : memref<8x128xf32, #tpu.memory_space<vmem>>, vector<8x128xf32>
    %c0_1 = arith.constant 0 : index
    %c0_2 = arith.constant 0 : index
    %1 = memref.load %arg2[%c0_1, %c0_2] : memref<1x1xf32, #tpu.memory_space<smem>>
    %2 = vector.broadcast %1 : f32 to vector<8x128xf32>
    %3 = arith.mulf %0, %2 : vector<8x128xf32>
    %c0_3 = arith.constant 0 : index
    %c0_4 = arith.constant 0 : index
    %4 = memref.load %arg3[%c0_3, %c0_4] : memref<1x1xf32, #tpu.memory_space<smem>>
    %5 = vector.broadcast %4 : f32 to vector<8x128xf32>
    %6 = arith.addf %3, %5 : vector<8x128xf32>
    %c0_5 = arith.constant 0 : index
    %c0_6 = arith.constant 0 : index
    %7 = vector.load %arg4[%c0_5, %c0_6] : memref<8x128xf32, #tpu.memory_space<vmem>>, vector<8x128xf32>
    tpu.vector_store %arg4[%c0_5, %c0_6], %6 {strides = array<i32>} : memref<8x128xf32, #tpu.memory_space<vmem>>, vector<8x128xf32>,
    return
  }
  func.func @transform_0(%arg0: i32) -> (i32, i32) {
    %c0_i32 = arith.constant 0 : i32
    %c0_i32_0 = arith.constant 0 : i32
    return %arg0, %c0_i32 : i32, i32
  }
  func.func @transform_1(%arg0: i32) -> (i32, i32) {
    %c0_i32 = arith.constant 0 : i32
    %c0_i32_0 = arith.constant 0 : i32
    %c0_i32_1 = arith.constant 0 : i32
    return %c0_i32, %c0_i32_0 : i32, i32
  }
  func.func @transform_2(%arg0: i32) -> (i32, i32) {
    %c0_i32 = arith.constant 0 : i32
    %c0_i32_0 = arith.constant 0 : i32
    %c0_i32_1 = arith.constant 0 : i32
    return %c0_i32, %c0_i32_0 : i32, i32
  }
  func.func @transform_3(%arg0: i32) -> (i32, i32) {
    %c0_i32 = arith.constant 0 : i32
    %c0_i32_0 = arith.constant 0 : i32
    return %arg0, %c0_i32 : i32, i32
  }
}

</mosaic_0001>

<bundles_post_ra>
// kernel: tpu_custom_call.1
= control target key start
LH: loop header
LB: loop body
LE: loop exit
PB: predicated region body
PF: predicated region fallthrough
CT: control target
= control target key end

     0   :  { %10 = vsyncpa [#allocation5], 0  ;;  %s144_s0 = inlined_call_operand.hbm [shape: f32[8,128], index: 0, kind: input, shape index: {}]   ;;  %s145_s1 = inlined_call_operand.<no memory space> [shape: f32[1,1], index: 1, kind: input, shape index: {}]   ;;  %s146_s2 = inlined_call_operand.<no memory space> [shape: f32[1,1], index: 2, kind: input, shape index: {}]   ;;  %s147_s3 = inlined_call_operand.hbm [shape: f32[8,128], index: 3, kind: output, shape index: {}]  }
   0x1   :  { %11 = vsyncpa [#allocation6], 0  ;;  %s17_s14 = sshll.u32 %s144_s0, 4  ;;  %s110_s15 = smov [#allocation4]   ;;  %s18_s14 = int_to_ptr.hbm [resolvable:$true] %s17_s14 }
   0x2   :  { %s19_s16 = sshll.u32 %s110_s15, 4  ;;  %s20_s16 = int_to_ptr.vmem [resolvable:$true] %s19_s16 }
   0x3   :  { %22 = dma.hbm_to_vmem [thread:$0]  %s18_s14, 128, %s20_s16, [#allocation5]  }
   0x4   :  { %106 = dma.done.wait [#allocation5], 128  }
   0x5   :  { %107 = vsyncadd [#allocation5], 4294967168  ;;  %v33_v0 = vstv %s145_s1  ;;  %v31_v1 = vld [vmem:[#allocation4] sm:$0xff]  ;;  %v36_v2 = vstv %s146_s2  ;;  %s111_s21 = smov [#allocation7]   ;;  %s46_s24 = sshll.u32 %s147_s3, 4  ;;  %s47_s24 = int_to_ptr.hbm [resolvable:$true] %s46_s24 }
   0x6   :  { %s44_s22 = sshll.u32 %s111_s21, 4  ;;  %v34_v3 = vmul.f32 %v33_v0, %v31_v1  ;;  %s45_s22 = int_to_ptr.vmem [resolvable:$true] %s44_s22 }
   0x8   :  { %v37_v4 = vadd.f32 %v36_v2, %v34_v3 }
   0xa   :  { %38 = vst [vmem:[#allocation7] sm:$0xff] %v37_v4 }
   0xb   :  { %49 = dma.vmem_to_hbm [thread:$0]  %s45_s22, 128, %s47_s24, [#allocation6]  }
   0xc   :  { %108 = dma.done.wait [#allocation6], 128  }
   0xd   :  { %109 = vsyncadd [#allocation6], 4294967168 }
   0xe   :  { %54 = vsyncpa [#allocation5], 1 }
   0xf   :  { %55 = vsyncpa [#allocation6], 1 }

</bundles_post_ra>
